<compile_context>
chip_gen: v5e
topology: v5e:2x2
jax: 0.10.0
libtpu: 0.0.40
codegen_flags: <defaults>
</compile_context>

<pallas_src>
import functools

import jax
import jax.numpy as jnp
from jax.experimental import pallas as pl
from jax.experimental.pallas import tpu as pltpu

_LANES = 128
_SUBLANES = 8
_MAX_BLOCK_C = 8192          # cap on lanes per block (bounds in-kernel unroll)


def _round_up(x, m):
    return (x + m - 1) // m * m


def _round_down(x, m):
    return x // m * m


def _mlsm_kernel(x_ref, y_ref, o_ref, *, block_n, block_c, n_rows, n_cols,
                 grid_n, grid_c, rows_outer, row_edge, col_edge):
    """Accumulate sum over this tile of softplus(x) - y*x into an (8,128) block."""
    if rows_outer:
        i = pl.program_id(0)          # row-block index (parallel axis)
        j = pl.program_id(1)          # col-block index (reduction axis)
    else:
        j = pl.program_id(0)          # col-block index (parallel axis)
        i = pl.program_id(1)          # row-block index (reduction axis)

    # Inner grid axis is the reduction axis for this accumulator block.
    @pl.when(pl.program_id(1) == 0)
    def _init():
        o_ref[...] = jnp.zeros_like(o_ref)

    x = x_ref[...].astype(jnp.float32)
    y = y_ref[...].astype(jnp.float32)            # matches target.float()

    # Stable softplus; per-element loss = softplus(x) - y*x.
    sp = jnp.maximum(x, 0.0) + jnp.log1p(jnp.exp(-jnp.abs(x)))
    per_elem = sp - y * x

    def _accum(pe):
        # (block_n, block_c) -> (block_n, 128): add 128-lane tiles (static,
        # 128-aligned slices -> plain VPU vreg adds, no XLU).
        s = pe[:, :_LANES]
        for c0 in range(_LANES, block_c, _LANES):
            s = s + pe[:, c0:c0 + _LANES]
        # (block_n, 128) -> (8, 128): free sublane-split reshape + VPU adds.
        o_ref[...] += s.reshape(block_n // _SUBLANES, _SUBLANES, _LANES).sum(axis=0)

    if not (row_edge or col_edge):
        _accum(per_elem)
    else:
        if row_edge and col_edge:
            on_edge = jnp.logical_or(i == grid_n - 1, j == grid_c - 1)
        elif row_edge:
            on_edge = i == grid_n - 1
        else:
            on_edge = j == grid_c - 1

        @pl.when(on_edge)
        def _boundary():
            # Only boundary tiles pay for the iota/compare/select masking.
            valid = None
            if row_edge:
                r_idx = jax.lax.broadcasted_iota(jnp.int32, (block_n, block_c), 0)
                valid = r_idx < (n_rows - i * block_n)
            if col_edge:
                c_idx = jax.lax.broadcasted_iota(jnp.int32, (block_n, block_c), 1)
                c_ok = c_idx < (n_cols - j * block_c)
                valid = c_ok if valid is None else jnp.logical_and(valid, c_ok)
            _accum(jnp.where(valid, per_elem, 0.0))

        @pl.when(jnp.logical_not(on_edge))
        def _interior():
            _accum(per_elem)


def multilabel_soft_margin_loss(inp, target, *, tile_budget_bytes=6 * 1024 * 1024):
    """Pallas implementation of nn.MultiLabelSoftMarginLoss (mean reduction)."""
    assert inp.ndim == 2 and inp.shape == target.shape
    N, C = inp.shape
    n_elems = N * C

    x_item = jnp.dtype(inp.dtype).itemsize
    y_item = jnp.dtype(target.dtype).itemsize
    # Sub-32-bit dtypes pack along sublanes: align row blocks to the packing of
    # the narrowest operand (f32 -> 8, bf16 -> 16, int8 -> 32).
    row_align = max(_SUBLANES, 32 // min(x_item, y_item, 4))
    budget_elems = max(row_align * _LANES, tile_budget_bytes // (x_item + y_item))

    C_pad = _round_up(C, _LANES)
    N_pad = _round_up(N, row_align)

    # Columns: as lane-dense as the budget allows.
    block_c = min(C_pad, _MAX_BLOCK_C,
                  max(_LANES, _round_down(budget_elems // row_align, _LANES)))
    grid_c = pl.cdiv(C, block_c)
    block_c = min(block_c, _round_up(pl.cdiv(C, grid_c), _LANES))   # balance tiles
    grid_c = pl.cdiv(C, block_c)

    # Rows: spend the remaining budget.
    block_n = min(N_pad, max(row_align,
                             _round_down(budget_elems // block_c, row_align)))
    grid_n = pl.cdiv(N, block_n)
    block_n = min(block_n, _round_up(pl.cdiv(N, grid_n), row_align))  # balance
    grid_n = pl.cdiv(N, block_n)

    row_edge = grid_n * block_n > N            # static: last row block is ragged
    col_edge = grid_c * block_c > C            # static: last col block is ragged

    # Leading ("parallel") grid axis = dimension with more tiles; trailing axis
    # is the per-accumulator reduction.
    rows_outer = grid_n >= grid_c
    if rows_outer:
        grid = (grid_n, grid_c)
        in_map = lambda p, r: (p, r)
        out_rows = grid_n
    else:
        grid = (grid_c, grid_n)
        in_map = lambda p, r: (r, p)
        out_rows = grid_c

    kernel = functools.partial(
        _mlsm_kernel,
        block_n=block_n, block_c=block_c,
        n_rows=N, n_cols=C,
        grid_n=grid_n, grid_c=grid_c,
        rows_outer=rows_outer, row_edge=row_edge, col_edge=col_edge)

    partial_sums = pl.pallas_call(
        kernel,
        out_shape=jax.ShapeDtypeStruct((out_rows * _SUBLANES, _LANES), jnp.float32),
        grid_spec=pltpu.PrefetchScalarGridSpec(
            num_scalar_prefetch=0,
            grid=grid,
            in_specs=[pl.BlockSpec((block_n, block_c), in_map),
                      pl.BlockSpec((block_n, block_c), in_map)],
            out_specs=pl.BlockSpec((_SUBLANES, _LANES), lambda p, r: (p, 0)),
        ),
        # TODO(synk): on v7x, verify the leading "parallel" axis shards across
        # both TensorCores in xprof; if not, switch it to pltpu.CORE_PARALLEL.
        compiler_params=pltpu.CompilerParams(
            dimension_semantics=("parallel", "arbitrary"),
            vmem_limit_bytes=32 * 1024 * 1024,
        ),
    )(inp, target)

    # Final tiny reduction + mean outside the kernel.
    return jnp.sum(partial_sums) / jnp.float32(n_elems)


class Criterion:
    """Mirror of the PyTorch Criterion module (MultiLabelSoftMarginLoss)."""

    def __call__(self, inp, target):
        return multilabel_soft_margin_loss(inp, target)


def _ref_loss(x, t):
    xf = x.astype(jnp.float32)
    tf = t.astype(jnp.float32)
    sp_pos = jnp.maximum(xf, 0.0) + jnp.log1p(jnp.exp(-jnp.abs(xf)))
    sp_neg = sp_pos - xf
    return jnp.mean(tf * sp_neg + (1.0 - tf) * sp_pos)


if __name__ == "__main__":
    key = jax.random.PRNGKey(0)
    k1, k2, k3, k4, k5, k6 = jax.random.split(key, 6)
    criterion = Criterion()

    # Case 1: typical [batch, num_classes] usage with int8 multi-hot targets
    # (single block larger than the array; both ragged edges masked).
    N1, C1 = 8, 32
    x1 = jax.random.normal(k1, (N1, C1), dtype=jnp.float32)
    t1 = (jax.random.uniform(k2, (N1, C1)) > 0.5).astype(jnp.int8)
    loss1 = criterion(x1, t1)
    jax.block_until_ready(loss1)
    ref1 = _ref_loss(x1, t1)
    assert jnp.allclose(loss1, ref1, rtol=1e-5, atol=1e-6), (loss1, ref1)

    # Case 2: multi-tile path (both grid axes > 1), ragged row & column edges,
    # column-parallel orientation — forced by a tiny tile budget.
    N2, C2 = 70, 600
    x2 = jax.random.normal(k3, (N2, C2), dtype=jnp.float32)
    t2 = (jax.random.uniform(k4, (N2, C2)) > 0.5).astype(jnp.int8)
    loss2 = multilabel_soft_margin_loss(x2, t2, tile_budget_bytes=32 * 1024)
    jax.block_until_ready(loss2)
    ref2 = _ref_loss(x2, t2)
    assert jnp.allclose(loss2, ref2, rtol=5e-5, atol=1e-6), (loss2, ref2)

    # Case 3: float targets, exactly tile-aligned (unmasked fast path).
    N3, C3 = 64, 256
    x3 = jax.random.normal(k5, (N3, C3), dtype=jnp.float32)
    t3 = (jax.random.uniform(k6, (N3, C3)) > 0.5).astype(jnp.float32)
    loss3 = criterion(x3, t3)
    jax.block_until_ready(loss3)
    ref3 = _ref_loss(x3, t3)
    assert jnp.allclose(loss3, ref3, rtol=1e-5, atol=1e-6), (loss3, ref3)

    print("KERNEL_OK")
</pallas_src>

<mosaic_0001>
module attributes {stable_mosaic.version = 11 : i64} {
  func.func @_mlsm_kernel(%arg0: i32, %arg1: i32, %arg2: memref<32x128xf32, #tpu.memory_space<vmem>>, %arg3: memref<32x128xi8, #tpu.memory_space<vmem>>, %arg4: memref<8x128xf32, #tpu.memory_space<vmem>>) attributes {dimension_semantics = [#tpu.dimension_semantics<parallel>, #tpu.dimension_semantics<arbitrary>], iteration_bounds = array<i64: 1, 1>, scalar_prefetch = 0 : i64, scratch_operands = 0 : i64, tpu.core_type = #tpu.core_type<tc>, window_params = [{transform_indices = @transform_0, window_bounds = array<i64: 32, 128>}, {transform_indices = @transform_1, window_bounds = array<i64: 32, 128>}, {transform_indices = @transform_2, window_bounds = array<i64: 8, 128>}]} {
    %c0_i32 = arith.constant 0 : i32
    %0 = arith.cmpi eq, %arg1, %c0_i32 : i32
    %1 = arith.extui %0 : i1 to i32
    %c0_i32_0 = arith.constant 0 : i32
    %2 = arith.cmpi ne, %1, %c0_i32_0 : i32
    scf.if %2 {
      %cst_9 = arith.constant 0.000000e+00 : f32
      %24 = vector.broadcast %cst_9 : f32 to vector<8x128xf32>
      %c0_10 = arith.constant 0 : index
      %c0_11 = arith.constant 0 : index
      %25 = vector.load %arg4[%c0_10, %c0_11] : memref<8x128xf32, #tpu.memory_space<vmem>>, vector<8x128xf32>
      tpu.vector_store %arg4[%c0_10, %c0_11], %24 {strides = array<i32>} : memref<8x128xf32, #tpu.memory_space<vmem>>, vector<8x128xf32>,
    } else {
    }
    %c0 = arith.constant 0 : index
    %c0_1 = arith.constant 0 : index
    %3 = vector.load %arg2[%c0, %c0_1] : memref<32x128xf32, #tpu.memory_space<vmem>>, vector<32x128xf32>
    %c0_2 = arith.constant 0 : index
    %c0_3 = arith.constant 0 : index
    %4 = vector.load %arg3[%c0_2, %c0_3] : memref<32x128xi8, #tpu.memory_space<vmem>>, vector<32x128xi8>
    %5 = arith.sitofp %4 : vector<32x128xi8> to vector<32x128xf32>
    %cst = arith.constant 0.000000e+00 : f32
    %6 = vector.broadcast %cst : f32 to vector<32x128xf32>
    %7 = arith.maximumf %3, %6 : vector<32x128xf32>
    %8 = math.absf %3 : vector<32x128xf32>
    %cst_4 = arith.constant 0.000000e+00 : f32
    %9 = vector.broadcast %cst_4 : f32 to vector<32x128xf32>
    %10 = arith.subf %9, %8 : vector<32x128xf32>
    %11 = math.exp %10 : vector<32x128xf32>
    %12 = math.log1p %11 : vector<32x128xf32>
    %13 = arith.addf %7, %12 : vector<32x128xf32>
    %14 = arith.mulf %5, %3 : vector<32x128xf32>
    %15 = arith.subf %13, %14 : vector<32x128xf32>
    %c0_i32_5 = arith.constant 0 : i32
    %16 = arith.cmpi eq, %arg0, %c0_i32_5 : i32
    %c0_i32_6 = arith.constant 0 : i32
    %17 = arith.cmpi eq, %arg1, %c0_i32_6 : i32
    %18 = arith.ori %16, %17 : i1
    %19 = arith.extui %18 : i1 to i32
    %c0_i32_7 = arith.constant 0 : i32
    %20 = arith.cmpi ne, %19, %c0_i32_7 : i32
    scf.if %20 {
      %24 = tpu.iota {dimensions = array<i32: 0>} : vector<32x128xi32>
      %c32_i32 = arith.constant 32 : i32
      %25 = arith.muli %arg0, %c32_i32 : i32
      %c8_i32 = arith.constant 8 : i32
      %26 = arith.subi %c8_i32, %25 : i32
      %27 = vector.broadcast %26 : i32 to vector<32x128xi32>
      %28 = arith.cmpi slt, %24, %27 : vector<32x128xi32>
      %29 = tpu.iota {dimensions = array<i32: 1>} : vector<32x128xi32>
      %c128_i32 = arith.constant 128 : i32
      %30 = arith.muli %arg1, %c128_i32 : i32
      %c32_i32_9 = arith.constant 32 : i32
      %31 = arith.subi %c32_i32_9, %30 : i32
      %32 = vector.broadcast %31 : i32 to vector<32x128xi32>
      %33 = arith.cmpi slt, %29, %32 : vector<32x128xi32>
      %34 = arith.andi %28, %33 : vector<32x128xi1>
      %cst_10 = arith.constant 0.000000e+00 : f32
      %35 = vector.broadcast %cst_10 : f32 to vector<32x128xf32>
      %36 = arith.select %34, %15, %35 : vector<32x128xi1>, vector<32x128xf32>
      %c0_11 = arith.constant 0 : index
      %c0_12 = arith.constant 0 : index
      %37 = vector.load %arg4[%c0_11, %c0_12] : memref<8x128xf32, #tpu.memory_space<vmem>>, vector<8x128xf32>
      %38 = vector.shape_cast %36 : vector<32x128xf32> to vector<4x8x128xf32>
      %cst_13 = arith.constant dense<0.000000e+00> : vector<8x128xf32>
      %39 = vector.multi_reduction <add>, %38, %cst_13 [0] : vector<4x8x128xf32> to vector<8x128xf32>
      %40 = arith.addf %37, %39 : vector<8x128xf32>
      %c0_14 = arith.constant 0 : index
      %c0_15 = arith.constant 0 : index
      %41 = vector.load %arg4[%c0_14, %c0_15] : memref<8x128xf32, #tpu.memory_space<vmem>>, vector<8x128xf32>
      tpu.vector_store %arg4[%c0_14, %c0_15], %40 {strides = array<i32>} : memref<8x128xf32, #tpu.memory_space<vmem>>, vector<8x128xf32>,
    } else {
    }
    %true = arith.constant true
    %21 = arith.xori %18, %true : i1
    %22 = arith.extui %21 : i1 to i32
    %c0_i32_8 = arith.constant 0 : i32
    %23 = arith.cmpi ne, %22, %c0_i32_8 : i32
    scf.if %23 {
      %c0_9 = arith.constant 0 : index
      %c0_10 = arith.constant 0 : index
      %24 = vector.load %arg4[%c0_9, %c0_10] : memref<8x128xf32, #tpu.memory_space<vmem>>, vector<8x128xf32>
      %25 = vector.shape_cast %15 : vector<32x128xf32> to vector<4x8x128xf32>
      %cst_11 = arith.constant dense<0.000000e+00> : vector<8x128xf32>
      %26 = vector.multi_reduction <add>, %25, %cst_11 [0] : vector<4x8x128xf32> to vector<8x128xf32>
      %27 = arith.addf %24, %26 : vector<8x128xf32>
      %c0_12 = arith.constant 0 : index
      %c0_13 = arith.constant 0 : index
      %28 = vector.load %arg4[%c0_12, %c0_13] : memref<8x128xf32, #tpu.memory_space<vmem>>, vector<8x128xf32>
      tpu.vector_store %arg4[%c0_12, %c0_13], %27 {strides = array<i32>} : memref<8x128xf32, #tpu.memory_space<vmem>>, vector<8x128xf32>,
    } else {
    }
    return
  }
  func.func @transform_0(%arg0: i32, %arg1: i32) -> (i32, i32) {
    %c0_i32 = arith.constant 0 : i32
    return %arg0, %arg1 : i32, i32
  }
  func.func @transform_1(%arg0: i32, %arg1: i32) -> (i32, i32) {
    %c0_i32 = arith.constant 0 : i32
    return %arg0, %arg1 : i32, i32
  }
  func.func @transform_2(%arg0: i32, %arg1: i32) -> (i32, i32) {
    %c0_i32 = arith.constant 0 : i32
    %c0_i32_0 = arith.constant 0 : i32
    return %arg0, %c0_i32 : i32, i32
  }
}

</mosaic_0001>

<bundles_post_ra>
// kernel: tpu_custom_call.1
= control target key start
LH: loop header
LB: loop body
LE: loop exit
PB: predicated region body
PF: predicated region fallthrough
CT: control target
= control target key end

     0   :  { %7 = vsyncpa [#allocation3], 0  ;;  %s318_s0 = inlined_call_operand.hbm [shape: f32[8,32], index: 0, kind: input, shape index: {}]   ;;  %s319_s1 = inlined_call_operand.hbm [shape: s8[8,32], index: 1, kind: input, shape index: {}]   ;;  %s320_s2 = inlined_call_operand.hbm [shape: f32[8,128], index: 2, kind: output, shape index: {}]  }
   0x1   :  { %8 = vsyncpa [#allocation6], 0 }
   0x2   :  { %9 = vsyncpa [#allocation4], 0 }
   0x3   :  { %13 = vsyncadd [#allocation3], 384  ;;  %s14_s11 = sshll.u32 %s318_s0, 4  ;;  %s287_s12 = smov [#allocation2]   ;;  %s15_s11 = int_to_ptr.hbm [resolvable:$true] %s14_s11 }
   0x4   :  { %s16_s13 = sshll.u32 %s287_s12, 4  ;;  %s288_s14 = smov 128   ;;  %s17_s13 = int_to_ptr.vmem [resolvable:$true] %s16_s13 }
   0x5   :  { %s289_s15 = smov 8  }
   0x6   :  { %22 = dma.hbm_to_vmem [thread:$0]  %s15_s11, 128, %s17_s13, [#allocation3], %s288_s14, %s288_s14, %s289_s15  }
   0x7   :  { %26 = vsyncadd [#allocation6], 96  ;;  %s27_s18 = sshll.u32 %s319_s1, 4  ;;  %s290_s19 = smov [#allocation5]   ;;  %s28_s18 = int_to_ptr.hbm [resolvable:$true] %s27_s18 }
   0x8   :  { %s29_s20 = sshll.u32 %s290_s19, 4  ;;  %s291_s21 = smov 32   ;;  %s30_s20 = int_to_ptr.vmem [resolvable:$true] %s29_s20 }
   0x9   :  { %s292_s22 = smov 2  }
   0xa   :  { %35 = dma.hbm_to_vmem [thread:$0]  %s28_s18, 32, %s30_s20, [#allocation6], %s291_s21, %s291_s21, %s292_s22  }
   0xb   :  { %281 = dma.done.wait [#allocation3], 512  }
   0xc   :  { %282 = vsyncadd [#allocation3], 4294966784 }
   0xd   :  { %283 = dma.done.wait [#allocation6], 128  }
   0xe   :  { %284 = vsyncadd [#allocation6], 4294967168  ;;  %v49_v0 = vld [vmem:[#allocation2] sm:$0xff]  ;;  %v150_v11 = vlaneseq  ;;  %s293_s0 = smov [#allocation7]   ;;  %s186_s25 = sshll.u32 %s320_s2, 4  ;;  %s187_s25 = int_to_ptr.hbm [resolvable:$true] %s186_s25 }
   0xf   :  { %v69_v1 = vand.u32 2147483647, %v49_v0  ;;  %v53_v5 = vld [vmem:[#allocation5] sm:$0x3]  ;;  %v65_v15 = vmax.f32 %v49_v0, 0.0  ;;  %s184_s1 = sshll.u32 %s293_s0, 4  ;;  %s185_s1 = int_to_ptr.vmem [resolvable:$true] %s184_s1 }
  0x10   :  { %v57_v8 = vunpack.c.0.s8 %v53_v5  ;;  %v151_v17 = vand.u32 127, %v150_v11 }
  0x11   :  { %v73_v2 = vsub.f32 0.0, %v69_v1 }
  0x12   :  { %v61_v12 = vcvt.s32.f32 %v57_v8  ;;  %vm155_vm1 = vcmp.lt.s32.totalorder %v151_v17, 32 }
  0x13   :  { %v77_v3 = vmul.f32 1.442695, %v73_v2 }
  0x14   :  { %v125_v18 = vmul.f32 %v61_v12, %v49_v0 }
  0x15   :  { %205 = vpow2.f32 %v77_v3 }
  0x1b   :  { %v206_v4 = vpop.eup %205 }
  0x1c   :  { %v85_v6 = vadd.f32 1.0, %v206_v4  ;;  %v88_v7 = vmul.f32 -0.5, %v206_v4  ;;  %v91_v10 = vand.u32 2147483647, %v206_v4 }
  0x1e   :  { %207 = vlog2.f32 %v85_v6  ;;  %v89_v9 = vadd.f32 1.0, %v88_v7  ;;  %vm92_vm0 = vcmp.lt.f32.partialorder %v91_v10, 0.0004427343 }
  0x20   :  { %v90_v13 = vmul.f32 %v206_v4, %v89_v9 }
  0x24   :  { %v208_v14 = vpop.eup %207 }
  0x25   :  { %v87_v16 = vmul.f32 0.6931472, %v208_v14 }
  0x27   :  { %v93_v19 = vsel %vm92_vm0, %v90_v13, %v87_v16 }
  0x28   :  { %v121_v20 = vadd.f32 %v93_v19, %v65_v15 }
  0x2a   :  { %v129_v21 = vsub.f32 %v121_v20, %v125_v18 }
  0x2c   :  { %v160_v22 = vsel %vm155_vm1, %v129_v21, 0.0 }
  0x2d   :  { %169 = vst [vmem:[#allocation7] sm:$0xff] %v160_v22 }
  0x2e   :  { %189 = dma.vmem_to_hbm [thread:$0]  %s185_s1, 128, %s187_s25, [#allocation4]  }
  0x2f   :  { %285 = dma.done.wait [#allocation4], 128  }
  0x30   :  { %286 = vsyncadd [#allocation4], 4294967168 }
  0x31   :  { %194 = vsyncpa [#allocation3], 1 }
  0x32   :  { %195 = vsyncpa [#allocation6], 1 }
  0x33   :  { %196 = vsyncpa [#allocation4], 1 }

</bundles_post_ra>
